<compile_context>
chip_gen: v7x
topology: tpu7x:2x2x1
jax: 0.10.0
libtpu: 0.0.40
codegen_flags: <defaults>
</compile_context>

<pallas_src>
from functools import partial

import jax
import jax.numpy as jnp
import numpy as np
from jax.experimental import pallas as pl
from jax.experimental.pallas import tpu as pltpu

EPS = 1e-5


# --------------------------------------------------------------------------
# block-size helpers (keep per-step blocks big but well under scoped VMEM)
# --------------------------------------------------------------------------
def _batch_block(B, per_batch_bytes, budget_bytes=2 << 20):
    bb = max(1, min(B, budget_bytes // max(per_batch_bytes, 1)))
    while B % bb:
        bb -= 1
    return bb


def _row_block(R, HW, budget_bytes=2 << 20):
    # rows per grid step: divide R, keep an (Rb, HW) f32 block under budget,
    # and keep Rb a multiple of 8 (sublane tile) unless it is the full extent.
    max_rows = max(1, budget_bytes // (HW * 4))
    if R <= max_rows:
        return R
    rb = max((max_rows // 8) * 8, 8)
    while R % rb:
        rb -= 8
        if rb < 8:
            return R
    return rb


# --------------------------------------------------------------------------
# Kernel 1: folded-BN(tokens) * sp_mat['weight']
#   out = (x * scale + bias) * w          (scale/bias precomputed per channel)
# --------------------------------------------------------------------------
def _norm_weight_kernel(tok_ref, w_ref, scale_ref, bias_ref, out_ref):
    out_ref[...] = (tok_ref[...] * scale_ref[...] + bias_ref[...]) * w_ref[...]


def norm_and_weight(tokens, sp_weight, bn_scale, bn_bias):
    # TODO(synk): at tiny sizes this elementwise op could simply be left to XLA
    # (it fuses into the downstream scatter); kept as a Pallas kernel per spec.
    B, C, N = tokens.shape
    Np = ((N + 127) // 128) * 128          # lane-dense output stores
    tok = tokens
    w = sp_weight.reshape(B, 1, N)
    if Np != N:
        pad = ((0, 0), (0, 0), (0, Np - N))
        tok = jnp.pad(tok, pad)
        w = jnp.pad(w, pad)

    Bb = _batch_block(B, C * Np * 4 * 3)   # tokens + weight + output per step
    tok_spec = pl.BlockSpec((Bb, C, Np), lambda b: (b, 0, 0))
    w_spec = pl.BlockSpec((Bb, 1, Np), lambda b: (b, 0, 0))
    prm_spec = pl.BlockSpec((C, 1), lambda b: (0, 0))

    out = pl.pallas_call(
        _norm_weight_kernel,
        out_shape=jax.ShapeDtypeStruct((B, C, Np), jnp.float32),
        grid=(B // Bb,),
        in_specs=[tok_spec, w_spec, prm_spec, prm_spec],
        out_specs=tok_spec,
        compiler_params=pltpu.CompilerParams(
            dimension_semantics=("parallel",)),
    )(tok, w, bn_scale.reshape(C, 1), bn_bias.reshape(C, 1))
    if Np != N:
        out = out[:, :, :N]
    return out


# --------------------------------------------------------------------------
# Kernel 2: (plane + skip) -> depthwise3x3 -> ReLU -> depthwise3x3 (= FFN)
#           then channel attention: sigmoid(rp * att_scale + att_bias) * rp
# Operates on flattened (rows, HW) where rows = B*C (per-row = per channel of
# one batch element).  3x3 conv = 9 XLU rotations + masked FMAs; boundary
# masks and weights are hoisted out of the tap loop.
# --------------------------------------------------------------------------
def _ffn_att_kernel(plane_ref, skip_ref, w1_ref, b1_ref, w2_ref, b2_ref,
                    as_ref, ab_ref, rp_ref, wgt_ref, *, H, W):
    HW = H * W
    x = plane_ref[...] + skip_ref[...]

    # lane-only row/col indices and boundary masks, built ONCE per step,
    # shared by both depthwise convs.
    flat = jax.lax.broadcasted_iota(jnp.int32, (1, HW), 1)
    row = flat // W
    col = flat - row * W
    row_ge1 = row >= 1
    row_leH = row <= H - 2
    col_ge1 = col >= 1
    col_leW = col <= W - 2

    masks = []
    for k in range(9):
        dy, dx = k // 3 - 1, k % 3 - 1
        m = None
        if dy == -1:
            m = row_ge1
        elif dy == 1:
            m = row_leH
        if dx == -1:
            m = col_ge1 if m is None else (m & col_ge1)
        elif dx == 1:
            m = col_leW if m is None else (m & col_leW)
        masks.append(m)

    def dwconv3x3(z, w_ref, b_ref):
        acc = jnp.zeros_like(z)
        for k in range(9):
            dy, dx = k // 3 - 1, k % 3 - 1
            shift = (-(dy * W + dx)) % HW
            sh = pltpu.roll(z, shift, 1) if shift else z   # XLU rotate
            if masks[k] is not None:
                sh = jnp.where(masks[k], sh, 0.0)
            acc = acc + sh * w_ref[k]                      # (rows,1) sublane bcast
        return acc + b_ref[...]

    h = jnp.maximum(dwconv3x3(x, w1_ref, b1_ref), 0.0)
    rp = dwconv3x3(h, w2_ref, b2_ref)
    rp_ref[...] = rp

    # att: Conv1d(C,C,1,groups=C,bias=False) + BN(eval) + Sigmoid, BN folded.
    wgt_ref[...] = jax.nn.sigmoid(rp * as_ref[...] + ab_ref[...]) * rp


def ffn_att(plane, skip_flat, w1, b1, w2, b2, att_scale, att_bias, H, W):
    B, C, HW = plane.shape
    R = B * C

    plane2 = plane.reshape(R, HW)
    skip2 = skip_flat.reshape(R, HW)

    # per-channel params tiled once to per-row (row r -> channel r % C)
    tile_c = lambda v: jnp.tile(v, B).reshape(R, 1)            # (C,) -> (R, 1)
    tile_w = lambda w: jnp.tile(w.T, (1, B))[:, :, None]       # (C,9) -> (9,R,1)

    Rb = _row_block(R, HW)
    row_spec = pl.BlockSpec((Rb, HW), lambda r: (r, 0))
    w_spec = pl.BlockSpec((9, Rb, 1), lambda r: (0, r, 0))
    p_spec = pl.BlockSpec((Rb, 1), lambda r: (r, 0))

    rp2, wgt2 = pl.pallas_call(
        partial(_ffn_att_kernel, H=H, W=W),
        out_shape=(jax.ShapeDtypeStruct((R, HW), jnp.float32),
                   jax.ShapeDtypeStruct((R, HW), jnp.float32)),
        grid=(R // Rb,),
        in_specs=[row_spec, row_spec, w_spec, p_spec, w_spec, p_spec,
                  p_spec, p_spec],
        out_specs=(row_spec, row_spec),
        compiler_params=pltpu.CompilerParams(
            dimension_semantics=("parallel",)),
    )(plane2, skip2, tile_w(w1), tile_c(b1), tile_w(w2), tile_c(b2),
      tile_c(att_scale), tile_c(att_bias))
    return rp2.reshape(B, C, HW), wgt2.reshape(B, C, HW)


# --------------------------------------------------------------------------
# SpatialMix.forward (non-compressed, eval) glue
# --------------------------------------------------------------------------
def spatial_mix_forward(tokens, sp_mat, skip, prm, H, W):
    B, C, N = tokens.shape
    HW = H * W

    # fold BN(eval) into scale/bias once in the wrapper
    bn_scale = prm['bn_gamma'] * jax.lax.rsqrt(prm['bn_var'] + EPS)
    bn_bias = prm['bn_beta'] - prm['bn_mean'] * bn_scale

    # norm(tokens) * weight  -> Pallas kernel 1
    normw = norm_and_weight(tokens, sp_mat['weight'], bn_scale, bn_bias)

    # TODO(synk): data-dependent scatter_add (cell_ind) kept in plain JAX;
    # an in-kernel version would need scalar-prefetched indices + DMA scatter.
    b_idx = jnp.arange(B)[:, None, None]
    c_idx = jnp.arange(C)[None, :, None]
    idx = jnp.broadcast_to(sp_mat['cell_ind'][:, None, :], (B, C, N))
    plane = jnp.zeros((B, C, HW), jnp.float32).at[b_idx, c_idx, idx].add(normw)

    skip_flat = skip.reshape(B, C, HW)

    # fold attention BN(eval) + 1x1 depthwise scale into scale/bias
    att_inv = prm['att_bn_gamma'] * jax.lax.rsqrt(prm['att_bn_var'] + EPS)
    att_scale = prm['att_s'] * att_inv
    att_bias = prm['att_bn_beta'] - prm['att_bn_mean'] * att_inv

    # FFN + attention gate -> Pallas kernel 2
    rp, wgt = ffn_att(plane, skip_flat, prm['w1'], prm['b1'], prm['w2'],
                      prm['b2'], att_scale, att_bias, H, W)

    # TODO(synk): data-dependent gather (inflate) kept in plain JAX.
    residual = jnp.take_along_axis(wgt, sp_mat['inflate'], axis=2)

    out_tokens = tokens + residual          # DropPath = identity (eval)
    residual_plane = rp.reshape(B, C, H, W)
    return out_tokens, residual_plane


# --------------------------------------------------------------------------
# Pure-JAX reference (same eval-mode semantics) for correctness check
# --------------------------------------------------------------------------
def reference_forward(tokens, sp_mat, skip, prm, H, W):
    B, C, N = tokens.shape
    HW = H * W
    x = (tokens - prm['bn_mean'][None, :, None]) \
        * jax.lax.rsqrt(prm['bn_var'][None, :, None] + EPS) \
        * prm['bn_gamma'][None, :, None] + prm['bn_beta'][None, :, None]
    x = x * sp_mat['weight'][:, None, :]
    b_idx = jnp.arange(B)[:, None, None]
    c_idx = jnp.arange(C)[None, :, None]
    idx = jnp.broadcast_to(sp_mat['cell_ind'][:, None, :], (B, C, N))
    plane = jnp.zeros((B, C, HW), jnp.float32).at[b_idx, c_idx, idx].add(x)
    plane = plane.reshape(B, C, H, W) + skip

    def dwconv(z, w, b):
        o = jax.lax.conv_general_dilated(
            z, w.reshape(C, 1, 3, 3), (1, 1), ((1, 1), (1, 1)),
            dimension_numbers=('NCHW', 'OIHW', 'NCHW'),
            feature_group_count=C)
        return o + b[None, :, None, None]

    h = jnp.maximum(dwconv(plane, prm['w1'], prm['b1']), 0.0)
    rp = dwconv(h, prm['w2'], prm['b2'])
    r = rp.reshape(B, C, HW)
    att = jax.nn.sigmoid(
        (r * prm['att_s'][None, :, None] - prm['att_bn_mean'][None, :, None])
        * jax.lax.rsqrt(prm['att_bn_var'][None, :, None] + EPS)
        * prm['att_bn_gamma'][None, :, None]
        + prm['att_bn_beta'][None, :, None])
    r = att * r
    r = jnp.take_along_axis(r, sp_mat['inflate'], axis=2)
    return tokens + r, rp


if __name__ == "__main__":
    B, C, H, W, N = 2, 8, 16, 16, 64
    HW = H * W

    key = jax.random.PRNGKey(0)
    ks = jax.random.split(key, 20)

    tokens = jax.random.normal(ks[0], (B, C, N), jnp.float32)
    skip = jax.random.normal(ks[1], (B, C, H, W), jnp.float32) * 0.1
    sp_mat = {
        'weight': jax.random.uniform(ks[2], (B, N), jnp.float32, 0.2, 1.0),
        'cell_ind': jax.random.randint(ks[3], (B, N), 0, HW, jnp.int32),
        'inflate': jax.random.randint(ks[4], (B, C, N), 0, HW, jnp.int32),
    }

    prm = {
        # nn.BatchNorm1d(C) on tokens (running stats, eval mode)
        'bn_gamma': 1.0 + 0.1 * jax.random.normal(ks[5], (C,), jnp.float32),
        'bn_beta': 0.05 * jax.random.normal(ks[6], (C,), jnp.float32),
        'bn_mean': 0.1 * jax.random.normal(ks[7], (C,), jnp.float32),
        'bn_var': jax.random.uniform(ks[8], (C,), jnp.float32, 0.5, 1.5),
        # ffn: Conv2d(C,C,3,padding=1,groups=C) x2, row-major (ky,kx) -> (C,9)
        'w1': 0.2 * jax.random.normal(ks[9], (C, 9), jnp.float32),
        'b1': 0.05 * jax.random.normal(ks[10], (C,), jnp.float32),
        'w2': 0.2 * jax.random.normal(ks[11], (C, 9), jnp.float32),
        'b2': 0.05 * jax.random.normal(ks[12], (C,), jnp.float32),
        # att: Conv1d(C,C,1,groups=C,bias=False) + BatchNorm1d(C) (eval)
        'att_s': 1.0 + 0.1 * jax.random.normal(ks[13], (C,), jnp.float32),
        'att_bn_gamma': 1.0 + 0.1 * jax.random.normal(ks[14], (C,), jnp.float32),
        'att_bn_beta': 0.05 * jax.random.normal(ks[15], (C,), jnp.float32),
        'att_bn_mean': 0.1 * jax.random.normal(ks[16], (C,), jnp.float32),
        'att_bn_var': jax.random.uniform(ks[17], (C,), jnp.float32, 0.5, 1.5),
    }

    out_tok, out_plane = spatial_mix_forward(tokens, sp_mat, skip, prm, H, W)
    jax.block_until_ready((out_tok, out_plane))

    ref_tok, ref_plane = reference_forward(tokens, sp_mat, skip, prm, H, W)
    jax.block_until_ready((ref_tok, ref_plane))

    np.testing.assert_allclose(np.asarray(out_plane), np.asarray(ref_plane),
                               rtol=1e-4, atol=1e-4)
    np.testing.assert_allclose(np.asarray(out_tok), np.asarray(ref_tok),
                               rtol=1e-4, atol=1e-4)
    print("KERNEL_OK")
</pallas_src>

<mosaic_0001>
module attributes {stable_mosaic.version = 11 : i64} {
  func.func @_norm_weight_kernel(%arg0: i32, %arg1: memref<2x8x128xf32, #tpu.memory_space<vmem>>, %arg2: memref<2x1x128xf32, #tpu.memory_space<vmem>>, %arg3: memref<8x1xf32, #tpu.memory_space<vmem>>, %arg4: memref<8x1xf32, #tpu.memory_space<vmem>>, %arg5: memref<2x8x128xf32, #tpu.memory_space<vmem>>) attributes {dimension_semantics = [#tpu.dimension_semantics<parallel>], iteration_bounds = array<i64: 1>, scalar_prefetch = 0 : i64, scratch_operands = 0 : i64, tpu.core_type = #tpu.core_type<tc>, window_params = [{transform_indices = @transform_0, window_bounds = array<i64: 2, 8, 128>}, {transform_indices = @transform_1, window_bounds = array<i64: 2, 1, 128>}, {pipeline_mode = #tpu.pipeline_mode<synchronous>, transform_indices = @transform_2, window_bounds = array<i64: 8, 1>}, {pipeline_mode = #tpu.pipeline_mode<synchronous>, transform_indices = @transform_3, window_bounds = array<i64: 8, 1>}, {transform_indices = @transform_4, window_bounds = array<i64: 2, 8, 128>}]} {
    %c0 = arith.constant 0 : index
    %c0_0 = arith.constant 0 : index
    %c0_1 = arith.constant 0 : index
    %0 = vector.load %arg1[%c0, %c0_0, %c0_1] : memref<2x8x128xf32, #tpu.memory_space<vmem>>, vector<2x8x128xf32>
    %c0_2 = arith.constant 0 : index
    %c0_3 = arith.constant 0 : index
    %1 = vector.load %arg3[%c0_2, %c0_3] : memref<8x1xf32, #tpu.memory_space<vmem>>, vector<8x1xf32>
    %2 = vector.shape_cast %1 : vector<8x1xf32> to vector<1x8x1xf32>
    %3 = vector.broadcast %2 : vector<1x8x1xf32> to vector<2x8x128xf32>
    %4 = arith.mulf %0, %3 : vector<2x8x128xf32>
    %c0_4 = arith.constant 0 : index
    %c0_5 = arith.constant 0 : index
    %5 = vector.load %arg4[%c0_4, %c0_5] : memref<8x1xf32, #tpu.memory_space<vmem>>, vector<8x1xf32>
    %6 = vector.shape_cast %5 : vector<8x1xf32> to vector<1x8x1xf32>
    %7 = vector.broadcast %6 : vector<1x8x1xf32> to vector<2x8x128xf32>
    %8 = arith.addf %4, %7 : vector<2x8x128xf32>
    %c0_6 = arith.constant 0 : index
    %c0_7 = arith.constant 0 : index
    %c0_8 = arith.constant 0 : index
    %9 = vector.load %arg2[%c0_6, %c0_7, %c0_8] : memref<2x1x128xf32, #tpu.memory_space<vmem>>, vector<2x1x128xf32>
    %10 = vector.broadcast %9 : vector<2x1x128xf32> to vector<2x8x128xf32>
    %11 = arith.mulf %8, %10 : vector<2x8x128xf32>
    %c0_9 = arith.constant 0 : index
    %c0_10 = arith.constant 0 : index
    %c0_11 = arith.constant 0 : index
    %12 = vector.load %arg5[%c0_9, %c0_10, %c0_11] : memref<2x8x128xf32, #tpu.memory_space<vmem>>, vector<2x8x128xf32>
    tpu.vector_store %arg5[%c0_9, %c0_10, %c0_11], %11 {strides = array<i32>} : memref<2x8x128xf32, #tpu.memory_space<vmem>>, vector<2x8x128xf32>,
    return
  }
  func.func @transform_0(%arg0: i32) -> (i32, i32, i32) {
    %c0_i32 = arith.constant 0 : i32
    %c0_i32_0 = arith.constant 0 : i32
    %c0_i32_1 = arith.constant 0 : i32
    return %arg0, %c0_i32, %c0_i32_0 : i32, i32, i32
  }
  func.func @transform_1(%arg0: i32) -> (i32, i32, i32) {
    %c0_i32 = arith.constant 0 : i32
    %c0_i32_0 = arith.constant 0 : i32
    %c0_i32_1 = arith.constant 0 : i32
    return %arg0, %c0_i32, %c0_i32_0 : i32, i32, i32
  }
  func.func @transform_2(%arg0: i32) -> (i32, i32) {
    %c0_i32 = arith.constant 0 : i32
    %c0_i32_0 = arith.constant 0 : i32
    %c0_i32_1 = arith.constant 0 : i32
    return %c0_i32, %c0_i32_0 : i32, i32
  }
  func.func @transform_3(%arg0: i32) -> (i32, i32) {
    %c0_i32 = arith.constant 0 : i32
    %c0_i32_0 = arith.constant 0 : i32
    %c0_i32_1 = arith.constant 0 : i32
    return %c0_i32, %c0_i32_0 : i32, i32
  }
  func.func @transform_4(%arg0: i32) -> (i32, i32, i32) {
    %c0_i32 = arith.constant 0 : i32
    %c0_i32_0 = arith.constant 0 : i32
    %c0_i32_1 = arith.constant 0 : i32
    return %arg0, %c0_i32, %c0_i32_0 : i32, i32, i32
  }
}

</mosaic_0001>

<bundles_post_ra>
// kernel: tpu_custom_call.1
= control target key start
LH: loop header
LB: loop body
LE: loop exit
PB: predicated region body
PF: predicated region fallthrough
CT: control target
= control target key end

     0   :  { %s160_s0 = inlined_call_operand.vmem [shape: f32[2,8,128], index: 0, kind: input, shape index: {}]   ;;  %s161_s1 = inlined_call_operand.vmem [shape: f32[2,1,128], index: 1, kind: input, shape index: {}]   ;;  %s162_s2 = inlined_call_operand.vmem [shape: f32[8,1], index: 2, kind: input, shape index: {}]   ;;  %s163_s3 = inlined_call_operand.vmem [shape: f32[8,1], index: 3, kind: input, shape index: {}]   ;;  %s164_s4 = inlined_call_operand.hbm [shape: f32[2,8,128], index: 4, kind: output, shape index: {}]  }
   0x1   :  { %v20_v0 = vld [vmem:[%s162_s2] sm:$0xff] }
   0x2   :  { %9 = vsyncpa [#allocation3], 0  ;;  %v101_v1 = vmov 0   ;;  %v28_v2 = vld [vmem:[%s163_s3] sm:$0xff]  ;;  %v19_v5 = vld [vmem:[%s160_s0 + $0x8] sm:$0xff]  ;;  %s102_s2 = smov [#allocation2]  }
   0x3   :  { %76 = vset.pattern.permute.xlu0 %v101_v1  ;;  %v18_v4 = vld [vmem:[%s160_s0] sm:$0xff]  ;;  %s59_s23 = sshll.u32 %s102_s2, 4  ;;  %s60_s23 = int_to_ptr.vmem [resolvable:$true] %s59_s23 }
   0x4   :  { %23 = vperm.xlu0 %76, %v20_v0   ;;  %v70_v8 = vld [vmem:[%s161_s1] ss:$0 sm:$0xff]  ;;  %v71_v9 = vld [vmem:[%s161_s1 + $0x1] ss:$0 sm:$0xff]  ;;  %s77_s0 = scalar_lea.vmem %s60_s23, 256  ;;  %p82_p1 = scmp.lt.s32.totalorder %s60_s23, %s60_s23 }
   0x5   :  { %p78_p0 = scmp.ne.s32.totalorder %s60_s23, %s77_s0  ;;  %p83_p2 = scmp.lt.s32.totalorder %s77_s0, %s77_s0 }
   0x7   :  { %p84_p3 = por %p83_p2, %p82_p1 }
   0x8   :  { %31 = vperm.xlu0 %76, %v28_v2  }
   0x9   :  { %p85_p4 = pnand %p84_p3, %p78_p0 }
  0x83   :  { %v24_v3 = vpop.permute.xlu0 %23 }
  0x84   :  { %v26_v6 = vmul.f32 %v24_v3, %v18_v4  ;;  %v27_v7 = vmul.f32 %v24_v3, %v19_v5 }
  0x87   :  { %v32_v10 = vpop.permute.xlu0 %31 }
  0x88   :  { %v34_v11 = vadd.f32 %v32_v10, %v26_v6  ;;  %v35_v12 = vadd.f32 %v32_v10, %v27_v7 }
  0x8a   :  { %v50_v13 = vmul.f32 %v70_v8, %v34_v11  ;;  %v51_v14 = vmul.f32 %v71_v9, %v35_v12 }
  0x8c   :  { %52 = vst [vmem:[#allocation2] sm:$0xff] %v50_v13  ;;  %53 = vst [vmem:[#allocation2 + $0x8] sm:$0xff] %v51_v14 }
  0x8d   :  { %88 = shalt.err (!%p85_p4)
}
  0x8e   :  { %s89_s29 = scalar_lea.hbm %s164_s4, 256 }
  0x8f   :  { %p90_p5 = scmp.ne.s32.totalorder %s164_s4, %s89_s29  ;;  %p93_p6 = scmp.lt.u32.totalorder %s89_s29, %s164_s4 }
  0x91   :  { %p95_p7 = pnand %p93_p6, %p90_p5 }
  0x93   :  { %98 = shalt.err (!%p95_p7)
}
  0x94   :  { %s103_s7 = smov 128   ;;  %s104_s8 = smov 8  }
  0x95   :  { %65 = dma.vmem_to_hbm [thread:$0]  %s60_s23, 256, %s164_s4, [#allocation3], %s103_s7, %s103_s7, %s104_s8  }
  0x96   :  { %99 = dma.done.wait [#allocation3], 256  }
  0x97   :  { %100 = vsyncadd [#allocation3], 4294967040 }
  0x98   :  { %69 = vsyncpa [#allocation3], 1 }

</bundles_post_ra>
